<compile_context>
chip_gen: v6e
topology: v6e:2x2x1
jax: 0.10.0
libtpu: 0.0.40
codegen_flags: <defaults>
</compile_context>

<pallas_src>
import math

import jax
import jax.numpy as jnp
from jax.experimental import pallas as pl
from jax.experimental.pallas import tpu as pltpu


def _gat_gate_kernel(gb_ref, x_ref, adj_ref, ww_ref, wb_ref, asym_ref, gw_ref,
                     out_ref):
    """One block of Bt batch elements per grid step (full (N,*) slabs in VMEM)."""
    Bt, N, Dp = x_ref.shape
    mdt = x_ref.dtype                               # MXU operand dtype (bf16 stays bf16)

    x = x_ref[...]                                  # (Bt, N, Dp)
    adj = adj_ref[...].astype(jnp.float32)          # (Bt, N, N)
    ww = ww_ref[...]                                # (Dp, Dp)
    wb = wb_ref[...].astype(jnp.float32)            # (1, Dp)
    a_sym = asym_ref[...]                           # (Dp, Dp)  == A + A.T
    gw = gw_ref[...].astype(jnp.float32)            # (2, Dp)  rows: [gate_wx, gate_wh]
    gb = gb_ref[0]                                  # scalar gate bias (SMEM)

    # ---- h = W(x): one tall (Bt*N, Dp) MXU matmul for the whole block -------
    x2 = x.reshape(Bt * N, Dp)
    h2 = jnp.dot(x2, ww, preferred_element_type=jnp.float32) + wb      # f32
    h_m = h2.astype(mdt).reshape(Bt, N, Dp)                            # MXU operand

    # ---- attention logits: e = (h @ A_sym) @ h^T (A pre-symmetrized) --------
    hA_m = jnp.dot(h2.astype(mdt), a_sym,
                   preferred_element_type=jnp.float32).astype(mdt).reshape(Bt, N, Dp)
    e = jnp.einsum('bjl,bkl->bjk', hA_m, h_m,
                   preferred_element_type=jnp.float32)                 # (Bt, N, N)

    # ---- masked softmax over dim 1, fused adjacency re-mask -----------------
    neg_big = jnp.float32(-9.0e15)
    logits = jnp.where(adj > 0, e, neg_big)
    m = jnp.max(logits, axis=1, keepdims=True)                         # (Bt, 1, N)
    p = jnp.exp(logits - m)
    inv_s = pl.reciprocal(jnp.sum(p, axis=1, keepdims=True), approx=True)
    att = p * (adj * inv_s)                                            # (Bt, N, N)

    # ---- h' = relu(att @ h) --------------------------------------------------
    hp = jnp.einsum('bjk,bkd->bjd', att.astype(mdt), h_m,
                    preferred_element_type=jnp.float32)
    hp = jnp.maximum(hp, 0.0)                                          # (Bt, N, Dp) f32

    # ---- gate(cat([x, h'])) == x.gwx + h'.gwh + gb as VPU mul + lane reduce -
    xf = x.astype(jnp.float32)
    g = (jnp.sum(xf * gw[0:1, :], axis=-1, keepdims=True)
         + jnp.sum(hp * gw[1:2, :], axis=-1, keepdims=True) + gb)      # (Bt, N, 1)
    coeff = jax.nn.sigmoid(g)

    # ---- blend: coeff*x + (1-coeff)*h'  ==  h' + coeff*(x - h') -------------
    out_ref[...] = (hp + coeff * (xf - hp)).astype(out_ref.dtype)


def _round_up(v, m):
    return ((v + m - 1) // m) * m


def _pick_batch_tile(batch, n):
    """Largest divisor of `batch` keeping ~<=256 flattened rows per grid step."""
    bt = 1
    for cand in range(1, batch + 1):
        if batch % cand == 0 and cand * n <= 256:
            bt = cand
    return bt


def gat_gate(x, adj, ww, wb, A, gate_w, gate_b):
    """GAT_gate forward.  x: (B, N, D), adj: (B, N, N)."""
    B, N, D = x.shape
    assert ww.shape == (D, D) and A.shape == (D, D), \
        "blend coeff*x + (1-coeff)*h' requires n_in_feature == n_out_feature"
    assert gate_w.shape == (2 * D, 1)

    # Fold the e + e.T symmetrisation into the bilinear parameter (exact).
    a_sym = A + A.T
    # gate(cat([x, h'], -1)) == x @ gate_w[:D] + h' @ gate_w[D:] + gate_b
    gw = jnp.concatenate([gate_w[:D].T, gate_w[D:].T], axis=0)          # (2, D)
    wb2 = jnp.reshape(wb, (1, D))

    # Lane-dense feature dim: zero-pad D to a multiple of 128 (numerically exact,
    # padded weight rows/cols are zero so padded output columns are zero).
    Dp = _round_up(D, 128)
    if Dp != D:
        pad = Dp - D
        x_p = jnp.pad(x, ((0, 0), (0, 0), (0, pad)))
        ww_p = jnp.pad(ww, ((0, pad), (0, pad)))
        wb_p = jnp.pad(wb2, ((0, 0), (0, pad)))
        a_p = jnp.pad(a_sym, ((0, pad), (0, pad)))
        gw_p = jnp.pad(gw, ((0, 0), (0, pad)))
    else:
        x_p, ww_p, wb_p, a_p, gw_p = x, ww, wb2, a_sym, gw

    gb_arr = jnp.reshape(jnp.asarray(gate_b, dtype=jnp.float32), (1,))

    Bt = _pick_batch_tile(B, N)
    grid = (B // Bt,)

    flops = 2 * B * N * (2 * Dp * Dp + 2 * N * Dp + 2 * Dp)
    cost = pl.CostEstimate(
        flops=flops,
        transcendentals=B * (N * N + N),               # softmax exp + sigmoid gate
        bytes_accessed=4 * (2 * x_p.size + adj.size + ww_p.size + a_p.size
                            + wb_p.size + gw_p.size + 1))

    out_p = pl.pallas_call(
        _gat_gate_kernel,
        out_shape=jax.ShapeDtypeStruct((B, N, Dp), x.dtype),
        grid=grid,
        in_specs=[
            pl.BlockSpec(memory_space=pltpu.MemorySpace.SMEM),      # gate bias (scalar)
            pl.BlockSpec((Bt, N, Dp), lambda b: (b, 0, 0)),         # x
            pl.BlockSpec((Bt, N, N), lambda b: (b, 0, 0)),          # adj
            pl.BlockSpec((Dp, Dp), lambda b: (0, 0)),               # Ww
            pl.BlockSpec((1, Dp), lambda b: (0, 0)),                # Wb
            pl.BlockSpec((Dp, Dp), lambda b: (0, 0)),               # A + A.T
            pl.BlockSpec((2, Dp), lambda b: (0, 0)),                # gate weights
        ],
        out_specs=pl.BlockSpec((Bt, N, Dp), lambda b: (b, 0, 0)),
        compiler_params=pltpu.CompilerParams(
            dimension_semantics=("parallel",),                      # megacore across blocks
            vmem_limit_bytes=64 * 1024 * 1024),
        cost_estimate=cost,
    )(gb_arr, x_p, adj, ww_p, wb_p, a_p, gw_p)

    return out_p[..., :D] if Dp != D else out_p
    # TODO(synk): for production N (~1k) on v7x (64 MiB VMEM), add a row-tile grid
    # axis with an online softmax over the streamed dim-1 axis and Buffered(1) on
    # the constant-index weight blocks; at these sizes full blocks fit with room.


def _gat_gate_ref(x, adj, ww, wb, A, gate_w, gate_b):
    """Pure-JAX reference mirroring the PyTorch forward exactly."""
    h = jnp.einsum('bnd,de->bne', x, ww) + jnp.reshape(wb, (1, 1, -1))
    e = jnp.einsum('bjl,bkl->bjk', jnp.einsum('bnl,lm->bnm', h, A), h)
    e = e + jnp.transpose(e, (0, 2, 1))
    att = jnp.where(adj > 0, e, jnp.float32(-9.0e15))
    att = jax.nn.softmax(att, axis=1)
    att = att * adj
    hp = jax.nn.relu(jnp.einsum('bij,bjk->bik', att, h))
    g = jax.nn.sigmoid(jnp.concatenate([x, hp], -1) @ gate_w + gate_b)
    return g * x + (1.0 - g) * hp


if __name__ == "__main__":
    key = jax.random.PRNGKey(0)
    k_x, k_adj, k_w, k_wb, k_a, k_g, k_gb = jax.random.split(key, 7)

    B, N, D = 2, 16, 32   # batch, nodes, features (n_in_feature == n_out_feature)

    x = jax.random.normal(k_x, (B, N, D), jnp.float32)

    # Symmetric 0/1 adjacency with self loops.
    r = jax.random.uniform(k_adj, (B, N, N), jnp.float32)
    adj = (r > 0.5).astype(jnp.float32)
    adj = jnp.maximum(adj, jnp.transpose(adj, (0, 2, 1)))
    adj = jnp.maximum(adj, jnp.eye(N, dtype=jnp.float32)[None])

    # Parameters (torch nn.Linear default init bounds); A small-random to
    # exercise the attention path (torch initializes it to zeros).
    bound_w = 1.0 / math.sqrt(D)
    ww = jax.random.uniform(k_w, (D, D), jnp.float32, -bound_w, bound_w)
    wb = jax.random.uniform(k_wb, (1, D), jnp.float32, -bound_w, bound_w)
    A = 0.1 * jax.random.normal(k_a, (D, D), jnp.float32)

    bound_g = 1.0 / math.sqrt(2 * D)
    gate_w = jax.random.uniform(k_g, (2 * D, 1), jnp.float32, -bound_g, bound_g)
    gate_b = jax.random.uniform(k_gb, (), jnp.float32, -bound_g, bound_g)

    out = gat_gate(x, adj, ww, wb, A, gate_w, gate_b)
    jax.block_until_ready(out)

    ref = _gat_gate_ref(x, adj, ww, wb, A, gate_w, gate_b)
    assert out.shape == (B, N, D) and out.dtype == jnp.float32
    assert bool(jnp.all(jnp.isfinite(out)))
    # Tolerance 2e-3 (was 1e-4): softmax normalisation now uses the EUP
    # approximate reciprocal (pl.reciprocal(approx=True)) per the perf review.
    assert bool(jnp.allclose(out, ref, rtol=2e-3, atol=2e-3)), \
        float(jnp.max(jnp.abs(out - ref)))
    print("KERNEL_OK")
</pallas_src>

<mosaic_0001>
module attributes {stable_mosaic.version = 11 : i64} {
  func.func @_gat_gate_kernel(%arg0: i32, %arg1: memref<1xf32, #tpu.memory_space<smem>>, %arg2: memref<2x16x128xf32, #tpu.memory_space<vmem>>, %arg3: memref<2x16x16xf32, #tpu.memory_space<vmem>>, %arg4: memref<128x128xf32, #tpu.memory_space<vmem>>, %arg5: memref<1x128xf32, #tpu.memory_space<vmem>>, %arg6: memref<128x128xf32, #tpu.memory_space<vmem>>, %arg7: memref<2x128xf32, #tpu.memory_space<vmem>>, %arg8: memref<2x16x128xf32, #tpu.memory_space<vmem>>) attributes {dimension_semantics = [#tpu.dimension_semantics<parallel>], iteration_bounds = array<i64: 1>, scalar_prefetch = 0 : i64, scratch_operands = 0 : i64, tpu.core_type = #tpu.core_type<tc>, window_params = [{transform_indices = @transform_0, window_bounds = array<i64: 1>}, {transform_indices = @transform_1, window_bounds = array<i64: 2, 16, 128>}, {transform_indices = @transform_2, window_bounds = array<i64: 2, 16, 16>}, {pipeline_mode = #tpu.pipeline_mode<synchronous>, transform_indices = @transform_3, window_bounds = array<i64: 128, 128>}, {pipeline_mode = #tpu.pipeline_mode<synchronous>, transform_indices = @transform_4, window_bounds = array<i64: 1, 128>}, {pipeline_mode = #tpu.pipeline_mode<synchronous>, transform_indices = @transform_5, window_bounds = array<i64: 128, 128>}, {pipeline_mode = #tpu.pipeline_mode<synchronous>, transform_indices = @transform_6, window_bounds = array<i64: 2, 128>}, {transform_indices = @transform_7, window_bounds = array<i64: 2, 16, 128>}]} {
    %c0 = arith.constant 0 : index
    %c0_0 = arith.constant 0 : index
    %c0_1 = arith.constant 0 : index
    %0 = vector.load %arg2[%c0, %c0_0, %c0_1] : memref<2x16x128xf32, #tpu.memory_space<vmem>>, vector<2x16x128xf32>
    %c0_2 = arith.constant 0 : index
    %c0_3 = arith.constant 0 : index
    %c0_4 = arith.constant 0 : index
    %1 = vector.load %arg3[%c0_2, %c0_3, %c0_4] : memref<2x16x16xf32, #tpu.memory_space<vmem>>, vector<2x16x16xf32>
    %c0_5 = arith.constant 0 : index
    %c0_6 = arith.constant 0 : index
    %2 = vector.load %arg4[%c0_5, %c0_6] : memref<128x128xf32, #tpu.memory_space<vmem>>, vector<128x128xf32>
    %c0_7 = arith.constant 0 : index
    %c0_8 = arith.constant 0 : index
    %3 = vector.load %arg5[%c0_7, %c0_8] : memref<1x128xf32, #tpu.memory_space<vmem>>, vector<1x128xf32>
    %c0_9 = arith.constant 0 : index
    %c0_10 = arith.constant 0 : index
    %4 = vector.load %arg6[%c0_9, %c0_10] : memref<128x128xf32, #tpu.memory_space<vmem>>, vector<128x128xf32>
    %c0_11 = arith.constant 0 : index
    %c0_12 = arith.constant 0 : index
    %5 = vector.load %arg7[%c0_11, %c0_12] : memref<2x128xf32, #tpu.memory_space<vmem>>, vector<2x128xf32>
    %c0_13 = arith.constant 0 : index
    %6 = memref.load %arg1[%c0_13] : memref<1xf32, #tpu.memory_space<smem>>
    %7 = vector.shape_cast %0 : vector<2x16x128xf32> to vector<32x128xf32>
    %cst = arith.constant dense<0.000000e+00> : vector<32x128xf32>
    %8 = tpu.matmul %7, %2, %cst {dimension_numbers = #tpu.dot_dimension_numbers<[1], [0], [0], [1], [0, 0, 1, 1], [], []>} : vector<32x128xf32>, vector<128x128xf32>, vector<32x128xf32> -> vector<32x128xf32>
    %9 = vector.broadcast %3 : vector<1x128xf32> to vector<32x128xf32>
    %10 = arith.addf %8, %9 : vector<32x128xf32>
    %11 = vector.shape_cast %10 : vector<32x128xf32> to vector<2x16x128xf32>
    %cst_14 = arith.constant dense<0.000000e+00> : vector<32x128xf32>
    %12 = tpu.matmul %10, %4, %cst_14 {dimension_numbers = #tpu.dot_dimension_numbers<[1], [0], [0], [1], [0, 0, 1, 1], [], []>} : vector<32x128xf32>, vector<128x128xf32>, vector<32x128xf32> -> vector<32x128xf32>
    %13 = vector.shape_cast %12 : vector<32x128xf32> to vector<2x16x128xf32>
    "tpu.trace_start"() <{level = 10 : i32, message = "bjl,bkl->bjk"}> : () -> ()
    %cst_15 = arith.constant dense<0.000000e+00> : vector<2x16x16xf32>
    %14 = tpu.matmul %13, %11, %cst_15 {dimension_numbers = #tpu.dot_dimension_numbers<[2], [2], [1], [1], [0, 0, 0, 1, 1, 1], [0], [0]>} : vector<2x16x128xf32>, vector<2x16x128xf32>, vector<2x16x16xf32> -> vector<2x16x16xf32>
    %cst_16 = arith.constant 0.000000e+00 : f32
    "tpu.trace_stop"() : () -> ()
    %15 = vector.broadcast %cst_16 : f32 to vector<2x16x16xf32>
    %16 = arith.cmpf ogt, %1, %15 : vector<2x16x16xf32>
    %cst_17 = arith.constant -9.000000e+15 : f32
    %17 = vector.broadcast %cst_17 : f32 to vector<2x16x16xf32>
    %18 = arith.select %16, %14, %17 : vector<2x16x16xi1>, vector<2x16x16xf32>
    %cst_18 = arith.constant dense<0xFF800000> : vector<2x16xf32>
    %19 = vector.multi_reduction <maximumf>, %18, %cst_18 [1] : vector<2x16x16xf32> to vector<2x16xf32>
    %20 = vector.shape_cast %19 : vector<2x16xf32> to vector<2x1x16xf32>
    %21 = vector.broadcast %20 : vector<2x1x16xf32> to vector<2x16x16xf32>
    %22 = arith.subf %18, %21 : vector<2x16x16xf32>
    %23 = math.exp %22 : vector<2x16x16xf32>
    %cst_19 = arith.constant dense<0.000000e+00> : vector<2x16xf32>
    %24 = vector.multi_reduction <add>, %23, %cst_19 [1] : vector<2x16x16xf32> to vector<2x16xf32>
    %25 = vector.shape_cast %24 : vector<2x16xf32> to vector<2x1x16xf32>
    %26 = tpu.reciprocal %25 {approx = true} : vector<2x1x16xf32> -> vector<2x1x16xf32>
    %27 = vector.broadcast %26 : vector<2x1x16xf32> to vector<2x16x16xf32>
    %28 = arith.mulf %1, %27 : vector<2x16x16xf32>
    %29 = arith.mulf %23, %28 : vector<2x16x16xf32>
    "tpu.trace_start"() <{level = 10 : i32, message = "bjk,bkd->bjd"}> : () -> ()
    %cst_20 = arith.constant dense<0.000000e+00> : vector<2x16x128xf32>
    %30 = tpu.matmul %29, %11, %cst_20 {dimension_numbers = #tpu.dot_dimension_numbers<[2], [1], [1], [2], [0, 0, 0, 1, 1, 2], [0], [0]>} : vector<2x16x16xf32>, vector<2x16x128xf32>, vector<2x16x128xf32> -> vector<2x16x128xf32>
    "tpu.trace_stop"() : () -> ()
    %cst_21 = arith.constant 0.000000e+00 : f32
    %31 = vector.broadcast %cst_21 : f32 to vector<2x16x128xf32>
    %32 = arith.maximumf %30, %31 : vector<2x16x128xf32>
    %33 = vector.extract_strided_slice %5 {offsets = [0, 0], sizes = [1, 128], strides = [1, 1]} : vector<2x128xf32> to vector<1x128xf32>
    %34 = vector.shape_cast %33 : vector<1x128xf32> to vector<1x1x128xf32>
    %35 = vector.broadcast %34 : vector<1x1x128xf32> to vector<2x16x128xf32>
    %36 = arith.mulf %0, %35 : vector<2x16x128xf32>
    %cst_22 = arith.constant dense<0.000000e+00> : vector<2x16xf32>
    %37 = vector.multi_reduction <add>, %36, %cst_22 [2] : vector<2x16x128xf32> to vector<2x16xf32>
    %38 = vector.shape_cast %37 : vector<2x16xf32> to vector<2x16x1xf32>
    %39 = vector.extract_strided_slice %5 {offsets = [1, 0], sizes = [1, 128], strides = [1, 1]} : vector<2x128xf32> to vector<1x128xf32>
    %40 = vector.shape_cast %39 : vector<1x128xf32> to vector<1x1x128xf32>
    %41 = vector.broadcast %40 : vector<1x1x128xf32> to vector<2x16x128xf32>
    %42 = arith.mulf %32, %41 : vector<2x16x128xf32>
    %cst_23 = arith.constant dense<0.000000e+00> : vector<2x16xf32>
    %43 = vector.multi_reduction <add>, %42, %cst_23 [2] : vector<2x16x128xf32> to vector<2x16xf32>
    %44 = vector.shape_cast %43 : vector<2x16xf32> to vector<2x16x1xf32>
    %45 = arith.addf %38, %44 : vector<2x16x1xf32>
    %46 = vector.broadcast %6 : f32 to vector<2x16x1xf32>
    %47 = arith.addf %45, %46 : vector<2x16x1xf32>
    %48 = arith.negf %47 : vector<2x16x1xf32>
    %49 = math.exp %48 : vector<2x16x1xf32>
    %cst_24 = arith.constant 1.000000e+00 : f32
    %50 = vector.broadcast %cst_24 : f32 to vector<2x16x1xf32>
    %51 = arith.addf %50, %49 : vector<2x16x1xf32>
    %52 = arith.divf %50, %51 : vector<2x16x1xf32>
    %53 = arith.subf %0, %32 : vector<2x16x128xf32>
    %54 = vector.broadcast %52 : vector<2x16x1xf32> to vector<2x16x128xf32>
    %55 = arith.mulf %54, %53 : vector<2x16x128xf32>
    %56 = arith.addf %32, %55 : vector<2x16x128xf32>
    %c0_25 = arith.constant 0 : index
    %c0_26 = arith.constant 0 : index
    %c0_27 = arith.constant 0 : index
    %57 = vector.load %arg8[%c0_25, %c0_26, %c0_27] : memref<2x16x128xf32, #tpu.memory_space<vmem>>, vector<2x16x128xf32>
    tpu.vector_store %arg8[%c0_25, %c0_26, %c0_27], %56 {strides = array<i32>} : memref<2x16x128xf32, #tpu.memory_space<vmem>>, vector<2x16x128xf32>,
    return
  }
  func.func @transform_0(%arg0: i32) -> i32 {
    %c0_i32 = arith.constant 0 : i32
    %c0_i32_0 = arith.constant 0 : i32
    return %c0_i32 : i32
  }
  func.func @transform_1(%arg0: i32) -> (i32, i32, i32) {
    %c0_i32 = arith.constant 0 : i32
    %c0_i32_0 = arith.constant 0 : i32
    %c0_i32_1 = arith.constant 0 : i32
    return %arg0, %c0_i32, %c0_i32_0 : i32, i32, i32
  }
  func.func @transform_2(%arg0: i32) -> (i32, i32, i32) {
    %c0_i32 = arith.constant 0 : i32
    %c0_i32_0 = arith.constant 0 : i32
    %c0_i32_1 = arith.constant 0 : i32
    return %arg0, %c0_i32, %c0_i32_0 : i32, i32, i32
  }
  func.func @transform_3(%arg0: i32) -> (i32, i32) {
    %c0_i32 = arith.constant 0 : i32
    %c0_i32_0 = arith.constant 0 : i32
    %c0_i32_1 = arith.constant 0 : i32
    return %c0_i32, %c0_i32_0 : i32, i32
  }
  func.func @transform_4(%arg0: i32) -> (i32, i32) {
    %c0_i32 = arith.constant 0 : i32
    %c0_i32_0 = arith.constant 0 : i32
    %c0_i32_1 = arith.constant 0 : i32
    return %c0_i32, %c0_i32_0 : i32, i32
  }
  func.func @transform_5(%arg0: i32) -> (i32, i32) {
    %c0_i32 = arith.constant 0 : i32
    %c0_i32_0 = arith.constant 0 : i32
    %c0_i32_1 = arith.constant 0 : i32
    return %c0_i32, %c0_i32_0 : i32, i32
  }
  func.func @transform_6(%arg0: i32) -> (i32, i32) {
    %c0_i32 = arith.constant 0 : i32
    %c0_i32_0 = arith.constant 0 : i32
    %c0_i32_1 = arith.constant 0 : i32
    return %c0_i32, %c0_i32_0 : i32, i32
  }
  func.func @transform_7(%arg0: i32) -> (i32, i32, i32) {
    %c0_i32 = arith.constant 0 : i32
    %c0_i32_0 = arith.constant 0 : i32
    %c0_i32_1 = arith.constant 0 : i32
    return %arg0, %c0_i32, %c0_i32_0 : i32, i32, i32
  }
}

</mosaic_0001>

<bundles_post_ra>
// kernel: tpu_custom_call.1
= control target key start
LH: loop header
LB: loop body
LE: loop exit
PB: predicated region body
PF: predicated region fallthrough
CT: control target
= control target key end

     0   :  { %13 = vsyncpa [#allocation4], 0  ;;  %s1250_s0 = inlined_call_operand.<no memory space> [shape: f32[1], index: 0, kind: input, shape index: {}]   ;;  %s1251_s1 = inlined_call_operand.hbm [shape: f32[2,16,128], index: 1, kind: input, shape index: {}]   ;;  %s1252_s2 = inlined_call_operand.hbm [shape: f32[2,16,16], index: 2, kind: input, shape index: {}]   ;;  %s1253_s3 = inlined_call_operand.hbm [shape: f32[128,128], index: 3, kind: input, shape index: {}]   ;;  %s1254_s4 = inlined_call_operand.vmem [shape: f32[1,128], index: 4, kind: input, shape index: {}]   ;;  %s1255_s5 = inlined_call_operand.hbm [shape: f32[128,128], index: 5, kind: input, shape index: {}]   ;;  %s1256_s6 = inlined_call_operand.vmem [shape: f32[2,128], index: 6, kind: input, shape index: {}]   ;;  %s1257_s7 = inlined_call_operand.hbm [shape: f32[2,16,128], index: 7, kind: output, shape index: {}]  }
   0x1   :  { %14 = vsyncpa [#allocation7], 0 }
   0x2   :  { %15 = vsyncpa [#allocation10], 0 }
   0x3   :  { %16 = vsyncpa [#allocation5], 0  ;;  %s1097_s24 = smov [#allocation6]   ;;  %s1098_s26 = smov [#allocation3]  }
   0x4   :  { %s36_s25 = sshll.u32 %s1097_s24, 4  ;;  %s24_s27 = sshll.u32 %s1098_s26, 4  ;;  %s37_s25 = int_to_ptr.vmem [resolvable:$true] %s36_s25  ;;  %s25_s27 = int_to_ptr.vmem [resolvable:$true] %s24_s27 }
   0x5   :  { %s997_s28 = scalar_lea.vmem %s37_s25, 512  ;;  %p1002_p1 = scmp.lt.s32.totalorder %s37_s25, %s37_s25 }
   0x6   :  { %p998_p0 = scmp.ne.s32.totalorder %s37_s25, %s997_s28  ;;  %p1003_p2 = scmp.lt.s32.totalorder %s997_s28, %s997_s28 }
   0x8   :  { %p1004_p3 = por %p1003_p2, %p1002_p1 }
   0xa   :  { %p1005_p4 = pnand %p1004_p3, %p998_p0 }
   0xc   :  { %1008 = shalt.err (!%p1005_p4)
}
   0xd   :  { %s1099_s29 = smov 128   ;;  %s1100_s30 = smov 8  }
   0xe   :  { %42 = dma.hbm_to_vmem [thread:$0]  %s1252_s2, 512, %s37_s25, [#allocation7], %s1099_s29, %s1099_s29, %s1100_s30  }
   0xf   :  { %s1017_s10 = scalar_lea.vmem %s25_s27, 512  ;;  %p1022_p6 = scmp.lt.s32.totalorder %s25_s27, %s25_s27 }
  0x10   :  { %p1018_p5 = scmp.ne.s32.totalorder %s25_s27, %s1017_s10  ;;  %p1023_p7 = scmp.lt.s32.totalorder %s1017_s10, %s1017_s10 }
  0x12   :  { %p1024_p8 = por %p1023_p7, %p1022_p6 }
  0x14   :  { %p1025_p9 = pnand %p1024_p8, %p1018_p5 }
  0x16   :  { %1028 = shalt.err (!%p1025_p9)
}
  0x17   :  { %30 = dma.hbm_to_vmem [thread:$0]  %s1251_s1, 512, %s25_s27, [#allocation4], %s1099_s29, %s1099_s29, %s1100_s30  }
  0x18   :  { %s1101_s13 = smov [#allocation8]   ;;  %s1102_s15 = smov [#allocation9]  }
  0x19   :  { %s48_s14 = sshll.u32 %s1101_s13, 4  ;;  %s62_s16 = sshll.u32 %s1102_s15, 4  ;;  %s49_s14 = int_to_ptr.vmem [resolvable:$true] %s48_s14  ;;  %s63_s16 = int_to_ptr.vmem [resolvable:$true] %s62_s16 }
  0x1a   :  { %s1037_s2 = scalar_lea.vmem %s49_s14, 2048  ;;  %p1042_p11 = scmp.lt.s32.totalorder %s49_s14, %s49_s14 }
  0x1b   :  { %p1038_p10 = scmp.ne.s32.totalorder %s49_s14, %s1037_s2  ;;  %p1043_p12 = scmp.lt.s32.totalorder %s1037_s2, %s1037_s2 }
  0x1d   :  { %p1044_p13 = por %p1043_p12, %p1042_p11 }
  0x1f   :  { %p1045_p0 = pnand %p1044_p13, %p1038_p10 }
  0x21   :  { %1048 = shalt.err (!%p1045_p0)
}
  0x22   :  { %54 = dma.hbm_to_vmem [thread:$0]  %s1253_s3, 2048, %s49_s14, [#allocation7], %s1099_s29, %s1099_s29, %s1100_s30  }
  0x23   :  { %s1057_s1 = scalar_lea.vmem %s63_s16, 2048  ;;  %p1062_p2 = scmp.lt.s32.totalorder %s63_s16, %s63_s16 }
  0x24   :  { %p1058_p1 = scmp.ne.s32.totalorder %s63_s16, %s1057_s1  ;;  %p1063_p3 = scmp.lt.s32.totalorder %s1057_s1, %s1057_s1 }
  0x26   :  { %p1064_p4 = por %p1063_p3, %p1062_p2 }
  0x28   :  { %p1065_p5 = pnand %p1064_p4, %p1058_p1 }
  0x2a   :  { %1068 = shalt.err (!%p1065_p5)
}
  0x2b   :  { %68 = dma.hbm_to_vmem [thread:$0]  %s1255_s5, 2048, %s63_s16, [#allocation10], %s1099_s29, %s1099_s29, %s1100_s30  }
  0x2c   :  { %1089 = dma.done.wait [#allocation4], 512  }
  0x2d   :  { %1090 = vsyncadd [#allocation4], 4294966784 }
  0x2e   :  { %1091 = dma.done.wait [#allocation7], 2560  }
  0x2f   :  { %1092 = vsyncadd [#allocation7], 4294964736 }
  0x30   :  { %1093 = dma.done.wait [#allocation10], 2048  }
  0x31   :  { %1094 = vsyncadd [#allocation10], 4294965248  ;;  %v106_v0 = vld [vmem:[#allocation8 + $0x78] sm:$0xff]  ;;  %v105_v1 = vld [vmem:[#allocation8 + $0x70] sm:$0xff]  ;;  %v685_v49 = vlaneseq  ;;  %vm460_vm2 = vcmask 130048  }
  0x32   :  { %850 = vmatprep.subr.mxu0 %v106_v0  ;;  %v104_v2 = vld [vmem:[#allocation8 + $0x68] sm:$0xff]  ;;  %v103_v3 = vld [vmem:[#allocation8 + $0x60] sm:$0xff]  ;;  %v102_v5 = vld [vmem:[#allocation8 + $0x58] sm:$0xff] }
  0x33   :  { %851 = vmatpush3.msra.mxu0 %v106_v0  ;;  %v1168_v4 = vld [vmem:[#allocation3] sm:$0xff]  ;;  %v123_v6 = vld [vmem:[#allocation9 + $0x78] sm:$0xff]  ;;  %v122_v7 = vld [vmem:[#allocation9 + $0x70] sm:$0xff]  ;;  %v1183_v50 = vshrl.u32 %v685_v49, 7 }
  0x34   :  { %852 = vmatprep.subr.mxu0 %v105_v1  ;;  %882 = vmatprep.mubr.f32.mxu0 %v1168_v4  ;;  %v101_v8 = vld [vmem:[#allocation8 + $0x50] sm:$0xff]  ;;  %v121_v9 = vld [vmem:[#allocation9 + $0x68] sm:$0xff]  ;;  %v120_v11 = vld [vmem:[#allocation9 + $0x60] sm:$0xff] }
  0x35   :  { %853 = vmatpush3.msra.mxu0 %v105_v1  ;;  %888 = vmatprep.subr.mxu1 %v123_v6  ;;  %v100_v10 = vld [vmem:[#allocation8 + $0x48] sm:$0xff]  ;;  %v99_v12 = vld [vmem:[#allocation8 + $0x40] sm:$0xff]  ;;  %v119_v13 = vld [vmem:[#allocation9 + $0x58] sm:$0xff]  ;;  %v687_v52 = vsub.s32 0, %v1183_v50 }
  0x36   :  { %854 = vmatprep.subr.mxu0 %v104_v2  ;;  %889 = vmatpush3.msra.mxu1 %v123_v6  ;;  %v98_v14 = vld [vmem:[#allocation8 + $0x38] sm:$0xff]  ;;  %v118_v15 = vld [vmem:[#allocation9 + $0x50] sm:$0xff]  ;;  %v117_v17 = vld [vmem:[#allocation9 + $0x48] sm:$0xff] }
  0x37   :  { %855 = vmatpush3.msra.mxu0 %v104_v2  ;;  %890 = vmatprep.subr.mxu1 %v122_v7  ;;  %v97_v16 = vld [vmem:[#allocation8 + $0x30] sm:$0xff]  ;;  %v96_v18 = vld [vmem:[#allocation8 + $0x28] sm:$0xff]  ;;  %v116_v19 = vld [vmem:[#allocation9 + $0x40] sm:$0xff] }
  0x38   :  { %856 = vmatprep.subr.mxu0 %v103_v3  ;;  %891 = vmatpush3.msra.mxu1 %v122_v7  ;;  %v95_v20 = vld [vmem:[#allocation8 + $0x20] sm:$0xff]  ;;  %v115_v21 = vld [vmem:[#allocation9 + $0x38] sm:$0xff]  ;;  %v114_v23 = vld [vmem:[#allocation9 + $0x30] sm:$0xff] }
  0x39   :  { %857 = vmatpush3.msra.mxu0 %v103_v3  ;;  %892 = vmatprep.subr.mxu1 %v121_v9  ;;  %v94_v22 = vld [vmem:[#allocation8 + $0x18] sm:$0xff]  ;;  %v93_v24 = vld [vmem:[#allocation8 + $0x10] sm:$0xff]  ;;  %v113_v25 = vld [vmem:[#allocation9 + $0x28] sm:$0xff] }
  0x3a   :  { %858 = vmatprep.subr.mxu0 %v102_v5  ;;  %893 = vmatpush3.msra.mxu1 %v121_v9  ;;  %v92_v26 = vld [vmem:[#allocation8 + $0x8] sm:$0xff]  ;;  %v112_v27 = vld [vmem:[#allocation9 + $0x20] sm:$0xff]  ;;  %v111_v29 = vld [vmem:[#allocation9 + $0x18] sm:$0xff] }
  0x3b   :  { %859 = vmatpush3.msra.mxu0 %v102_v5  ;;  %894 = vmatprep.subr.mxu1 %v120_v11  ;;  %v91_v28 = vld [vmem:[#allocation8] sm:$0xff]  ;;  %v1171_v30 = vld [vmem:[#allocation3 + $0x8] sm:$0xff]  ;;  %v1173_v31 = vld [vmem:[#allocation3 + $0x10] sm:$0xff] }
  0x3c   :  { %860 = vmatprep.subr.mxu0 %v101_v8  ;;  %895 = vmatpush3.msra.mxu1 %v120_v11  ;;  %v1177_v32 = vld [vmem:[#allocation3 + $0x18] sm:$0xff]  ;;  %v110_v33 = vld [vmem:[#allocation9 + $0x10] sm:$0xff]  ;;  %v109_v34 = vld [vmem:[#allocation9 + $0x8] sm:$0xff] }
  0x3d   :  { %861 = vmatpush3.msra.mxu0 %v101_v8  ;;  %896 = vmatprep.subr.mxu1 %v119_v13  ;;  %v108_v35 = vld [vmem:[#allocation9] sm:$0xff]  ;;  %v1198_v56 = vld [vmem:[#allocation6 + $0x8] sm:$0xff]  ;;  %v1203_v58 = vld [vmem:[#allocation6 + $0x18] sm:$0xff] }
  0x3e   :  { %862 = vmatprep.subr.mxu0 %v100_v10  ;;  %897 = vmatpush3.msra.mxu1 %v119_v13  ;;  %v785_v36 = vld [vmem:[%s1254_s4] ss:$0 sm:$0xff]  ;;  %vm453_vm0 = vcmp.gt.f32.partialorder %v1198_v56, 0.0  ;;  %v1206_v61 = vld [vmem:[#allocation6 + $0x10] sm:$0xff]  ;;  %vm455_vm3 = vcmp.gt.f32.partialorder %v1203_v58, 0.0 }
  0x3f   :  { %863 = vmatpush3.msra.mxu0 %v100_v10  ;;  %898 = vmatprep.subr.mxu1 %v118_v15  ;;  %v1188_v51 = vld [vmem:[%s1256_s6] sm:$0x3]  ;;  %vm454_vm4 = vcmp.gt.f32.partialorder %v1206_v61, 0.0 }
  0x40   :  { %864 = vmatprep.subr.mxu0 %v99_v12  ;;  %899 = vmatpush3.msra.mxu1 %v118_v15  ;;  %v1192_v53 = vrot.slane %v1188_v51, %v687_v52  ;;  %v1200_v57 = vld [vmem:[#allocation6] sm:$0xff] }
  0x41   :  { %865 = vmatpush3.msra.mxu0 %v99_v12  ;;  %900 = vmatprep.subr.mxu1 %v117_v17  ;;  %vm452_vm1 = vcmp.gt.f32.partialorder %v1200_v57, 0.0 }
  0x42   :  { %866 = vmatprep.subr.mxu0 %v98_v14  ;;  %901 = vmatpush3.msra.mxu1 %v117_v17  ;;  %v691_v54 = vmul.f32 %v1192_v53, %v1173_v31  ;;  %v689_v55 = vmul.f32 %v1192_v53, %v1168_v4 }
  0x43   :  { %867 = vmatpush3.msra.mxu0 %v98_v14  ;;  %902 = vmatprep.subr.mxu1 %v116_v19 }
  0x44   :  { %868 = vmatprep.subr.mxu0 %v97_v16  ;;  %903 = vmatpush3.msra.mxu1 %v116_v19 }
  0x45   :  { %869 = vmatpush3.msra.mxu0 %v97_v16  ;;  %904 = vmatprep.subr.mxu1 %v115_v21 }
  0x46   :  { %870 = vmatprep.subr.mxu0 %v96_v18  ;;  %905 = vmatpush3.msra.mxu1 %v115_v21 }
  0x47   :  { %871 = vmatpush3.msra.mxu0 %v96_v18  ;;  %906 = vmatprep.subr.mxu1 %v114_v23 }
  0x48   :  { %872 = vmatprep.subr.mxu0 %v95_v20  ;;  %907 = vmatpush3.msra.mxu1 %v114_v23 }
  0x49   :  { %873 = vmatpush3.msra.mxu0 %v95_v20  ;;  %908 = vmatprep.subr.mxu1 %v113_v25 }
  0x4a   :  { %874 = vmatprep.subr.mxu0 %v94_v22  ;;  %909 = vmatpush3.msra.mxu1 %v113_v25 }
  0x4b   :  { %875 = vmatpush3.msra.mxu0 %v94_v22  ;;  %910 = vmatprep.subr.mxu1 %v112_v27 }
  0x4c   :  { %876 = vmatprep.subr.mxu0 %v93_v24  ;;  %911 = vmatpush3.msra.mxu1 %v112_v27 }
  0x4d   :  { %877 = vmatpush3.msra.mxu0 %v93_v24  ;;  %912 = vmatprep.subr.mxu1 %v111_v29 }
  0x4e   :  { %878 = vmatprep.subr.mxu0 %v92_v26  ;;  %913 = vmatpush3.msra.mxu1 %v111_v29 }
  0x4f   :  { %879 = vmatpush3.msra.mxu0 %v92_v26  ;;  %914 = vmatprep.subr.mxu1 %v110_v33 }
  0x50   :  { %880 = vmatprep.subr.mxu0 %v91_v28  ;;  %915 = vmatpush3.msra.mxu1 %v110_v33 }
  0x51   :  { %881 = vmatpush3.msra.mxu0 %v91_v28  ;;  %916 = vmatprep.subr.mxu1 %v109_v34 }
  0x52   :  { %883 = vmatmul.mubr.f32.vlgmr.msra.gmra.mxu0 %v1171_v30  ;;  %917 = vmatpush3.msra.mxu1 %v109_v34 }
  0x53   :  { %885 = vmatprep.mubr.f32.mxu0 %v1173_v31  ;;  %918 = vmatprep.subr.mxu1 %v108_v35 }
  0x54   :  { %919 = vmatpush3.msra.mxu1 %v108_v35  ;;  %697 = vadd.xlane.f32.xlu1 %v691_v54 }
  0x55   :  { %693 = vadd.xlane.f32.xlu0 %v689_v55 }
  0x56   :  { %886 = vmatmul.mubr.f32.gmra.mxu0 %v1177_v32 }
 0x112   :  { %v884_v37 = vpop.f32.mrf.mxu0 }
 0x113   :  { %v204_v38 = vadd.f32 %v884_v37, %v785_v36 }
 0x114   :  { %v198_v39 = vpop.f32.mrf.mxu0 }
 0x115   :  { %v199_v40 = vadd.f32 %v785_v36, %v198_v39  ;;  %926 = vmatprep.subr.mxu0 %v204_v38 }
 0x116   :  { %v887_v41 = vpop.f32.mrf.mxu0  ;;  %927 = vmatpush3.xpose.msra.mxu0 %v204_v38 }
 0x117   :  { %v214_v42 = vadd.f32 %v887_v41, %v785_v36  ;;  %920 = vmatprep.mubr.f32.mxu1 %v199_v40  ;;  %928 = vmatprep.subr.mxu0 %v199_v40 }
 0x118   :  { %v208_v43 = vpop.f32.mrf.mxu0  ;;  %921 = vmatmul.mubr.f32.vlgmr.msra.gmra.mxu1 %v204_v38 }
 0x119   :  { %v209_v44 = vadd.f32 %v785_v36, %v208_v43  ;;  %933 = vmatprep.subr.mxu1 %v214_v42 }
 0x11a   :  { %929 = vmatpush3.xpose.msra.mxu0 %v199_v40  ;;  %934 = vmatpush3.xpose.msra.mxu1 %v214_v42 }
 0x11b   :  { %923 = vmatprep.mubr.f32.mxu1 %v209_v44  ;;  %935 = vmatprep.subr.mxu1 %v209_v44 }
 0x11c   :  { %940 = vmatprep.subr.mxu0 %v204_v38  ;;  %924 = vmatmul.mubr.f32.gmra.mxu1 %v214_v42 }
 0x11e   :  { %936 = vmatpush3.xpose.msra.mxu1 %v209_v44 }
 0x11f   :  { %947 = vmatprep.subr.mxu1 %v214_v42 }
 0x1d8   :  { %v922_v45 = vpop.f32.mrf.mxu1 }
 0x1da   :  { %v283_v46 = vpop.f32.mrf.mxu1 }
 0x1db   :  { %930 = vmatprep.mubr.f32.mxu0 %v283_v46 }
 0x1dc   :  { %v925_v47 = vpop.f32.mrf.mxu1  ;;  %931 = vmatmul.mubr.f32.vlgmr.msra.gmra.mxu0 %v922_v45 }
 0x1dd   :  { %941 = vmatpush3.msra.mxu0 %v204_v38 }
 0x1de   :  { %942 = vmatprep.subr.mxu0 %v199_v40  ;;  %v293_v48 = vpop.f32.mrf.mxu1 }
 0x1df   :  { %943 = vmatpush3.msra.mxu0 %v199_v40  ;;  %937 = vmatprep.mubr.f32.mxu1 %v293_v48 }
 0x1e0   :  { %938 = vmatmul.mubr.f32.vlgmr.msra.gmra.mxu1 %v925_v47 }
 0x1e1   :  { %948 = vmatpush3.msra.mxu1 %v214_v42 }
 0x1e2   :  { %949 = vmatprep.subr.mxu1 %v209_v44 }
 0x1e3   :  { %950 = vmatpush3.msra.mxu1 %v209_v44 }
 0x29c   :  { %v932_v59 = vpop.f32.mrf.mxu0 }
 0x29d   :  { %v457_v60 = vsel %vm453_vm0, %v932_v59, -9e+15 }
 0x29e   :  { %v368_v62 = vpop.f32.mrf.mxu0  ;;  %v462_v0 = vsel %vm460_vm2, %v457_v60, -inf }
 0x29f   :  { %v456_v63 = vsel %vm452_vm1, %v368_v62, -9e+15 }
 0x2a0   :  { %v461_v1 = vsel %vm460_vm2, %v456_v63, -inf  ;;  %v939_v2 = vpop.f32.mrf.mxu1 }
 0x2a1   :  { %v463_v3 = vmax.f32 %v461_v1, %v462_v0  ;;  %v459_v5 = vsel %vm455_vm3, %v939_v2, -9e+15 }
 0x2a2   :  { %v443_v6 = vpop.f32.mrf.mxu1  ;;  %v471_v9 = vsel %vm460_vm2, %v459_v5, -inf }
 0x2a3   :  { %v464_v7 = vrot.slane %v463_v3, 4  ;;  %v458_v8 = vsel %vm454_vm4, %v443_v6, -9e+15 }
 0x2a4   :  { %v470_v10 = vsel %vm460_vm2, %v458_v8, -inf }
 0x2a5   :  { %v465_v11 = vmax.f32 %v463_v3, %v464_v7  ;;  %v472_v12 = vmax.f32 %v470_v10, %v471_v9 }
 0x2a7   :  { %v466_v13 = vrot.slane %v465_v11, 2  ;;  %v473_v14 = vrot.slane %v472_v12, 4 }
 0x2a9   :  { %v467_v15 = vmax.f32 %v465_v11, %v466_v13  ;;  %v474_v16 = vmax.f32 %v472_v12, %v473_v14 }
 0x2ab   :  { %v468_v17 = vrot.slane %v467_v15, 1  ;;  %v475_v18 = vrot.slane %v474_v16, 2 }
 0x2ad   :  { %v469_v19 = vmax.f32 %v467_v15, %v468_v17  ;;  %v476_v20 = vmax.f32 %v474_v16, %v475_v18 }
 0x2af   :  { %v479_v21 = vsub.f32 %v456_v63, %v469_v19  ;;  %v480_v22 = vsub.f32 %v457_v60, %v469_v19  ;;  %v477_v23 = vrot.slane %v476_v20, 1 }
 0x2b1   :  { %v483_v24 = vmul.f32 1.442695, %v479_v21  ;;  %v485_v25 = vmul.f32 1.442695, %v480_v22  ;;  %v478_v26 = vmax.f32 %v476_v20, %v477_v23  ;;  %v721_v23 = vstv %s1250_s0  ;;  %s1103_s0 = smov [#allocation11]  }
 0x2b2   :  { %s771_s23 = sshll.u32 %s1103_s0, 4  ;;  %s772_s23 = int_to_ptr.vmem [resolvable:$true] %s771_s23 }
 0x2b3   :  { %961 = vpow2.f32 %v483_v24  ;;  %v481_v27 = vsub.f32 %v458_v8, %v478_v26  ;;  %v482_v28 = vsub.f32 %v459_v5, %v478_v26  ;;  %s1069_s24 = scalar_lea.vmem %s772_s23, 512  ;;  %p1074_p7 = scmp.lt.s32.totalorder %s772_s23, %s772_s23 }
 0x2b4   :  { %963 = vpow2.f32 %v485_v25  ;;  %p1070_p6 = scmp.ne.s32.totalorder %s772_s23, %s1069_s24  ;;  %p1075_p8 = scmp.lt.s32.totalorder %s1069_s24, %s1069_s24 }
 0x2b5   :  { %v487_v29 = vmul.f32 1.442695, %v481_v27  ;;  %v489_v33 = vmul.f32 1.442695, %v482_v28 }
 0x2b6   :  { %p1076_p9 = por %p1075_p8, %p1074_p7 }
 0x2b7   :  { %965 = vpow2.f32 %v487_v29 }
 0x2b8   :  { %967 = vpow2.f32 %v489_v33  ;;  %p1077_p10 = pnand %p1076_p9, %p1070_p6 }
 0x2c0   :  { %v962_v34 = vpop.eup %961 }
 0x2c1   :  { %v964_v35 = vpop.eup %963  ;;  %v491_v36 = vsel %vm460_vm2, %v962_v34, 0.0 }
 0x2c2   :  { %v492_v37 = vsel %vm460_vm2, %v964_v35, 0.0 }
 0x2c3   :  { %v493_v38 = vadd.f32 %v492_v37, %v491_v36 }
 0x2c4   :  { %v966_v39 = vpop.eup %965 }
 0x2c5   :  { %v968_v40 = vpop.eup %967  ;;  %v494_v41 = vrot.slane %v493_v38, 4  ;;  %v500_v42 = vsel %vm460_vm2, %v966_v39, 0.0 }
 0x2c6   :  { %v501_v43 = vsel %vm460_vm2, %v968_v40, 0.0 }
 0x2c7   :  { %v495_v44 = vadd.f32 %v494_v41, %v493_v38  ;;  %v502_v45 = vadd.f32 %v501_v43, %v500_v42 }
 0x2c9   :  { %v496_v46 = vrot.slane %v495_v44, 2  ;;  %v503_v47 = vrot.slane %v502_v45, 4 }
 0x2cb   :  { %v497_v48 = vadd.f32 %v496_v46, %v495_v44  ;;  %v504_v49 = vadd.f32 %v503_v47, %v502_v45 }
 0x2cd   :  { %v498_v52 = vrot.slane %v497_v48, 1  ;;  %v505_v54 = vrot.slane %v504_v49, 2 }
 0x2cf   :  { %v499_v55 = vadd.f32 %v498_v52, %v497_v48  ;;  %v506_v59 = vadd.f32 %v505_v54, %v504_v49 }
 0x2d1   :  { %969 = vrcp.f32 %v499_v55  ;;  %v507_v60 = vrot.slane %v506_v59, 1 }
 0x2d3   :  { %v508_v62 = vadd.f32 %v507_v60, %v506_v59 }
 0x2d5   :  { %971 = vrcp.f32 %v508_v62 }
 0x2de   :  { %v970_v63 = vpop.eup %969 }
 0x2df   :  { %v511_v0 = vmul.f32 %v970_v63, %v1200_v57  ;;  %v512_v1 = vmul.f32 %v970_v63, %v1198_v56  ;;  %v692_v56 = vmul.f32 %v1192_v53, %v1177_v32  ;;  %v690_v57 = vmul.f32 %v1192_v53, %v1171_v30 }
 0x2e1   :  { %v515_v2 = vmul.f32 %v962_v34, %v511_v0  ;;  %v516_v3 = vmul.f32 %v964_v35, %v512_v1  ;;  %699 = vadd.xlane.f32.xlu1 %v692_v56  ;;  %695 = vadd.xlane.f32.xlu0 %v690_v57 }
 0x2e2   :  { %v972_v5 = vpop.eup %971 }
 0x2e3   :  { %v513_v6 = vmul.f32 %v972_v5, %v1206_v61  ;;  %944 = vmatprep.mubr.msk.f32.mxu0 %vm460_vm2, %v515_v2  ;;  %v514_v7 = vmul.f32 %v972_v5, %v1203_v58  ;;  %v703_v61 = vsub.s32 1, %v1183_v50  ;;  %v698_v50 = vpop.xlane.xlu1 %697 }
 0x2e4   :  { %945 = vmatmul.mubr.msk.f32.vlgmr.msra.gmra.mxu0 %vm460_vm2, %v516_v3 }
 0x2e5   :  { %v517_v8 = vmul.f32 %v966_v39, %v513_v6  ;;  %v518_v9 = vmul.f32 %v968_v40, %v514_v7  ;;  %v704_v58 = vrot.slane %v1188_v51, %v703_v61  ;;  %v694_v51 = vpop.xlane.xlu0 %693 }
 0x2e7   :  { %951 = vmatprep.mubr.msk.f32.mxu1 %vm460_vm2, %v517_v8 }
 0x2e8   :  { %952 = vmatmul.mubr.msk.f32.vlgmr.msra.gmra.mxu1 %vm460_vm2, %v518_v9 }
 0x36a   :  { %v700_v21 = vpop.xlane.xlu1 %699  ;;  %v696_v22 = vpop.xlane.xlu0 %695 }
 0x3a4   :  { %v946_v10 = vpop.f32.mrf.mxu0 }
 0x3a5   :  { %v682_v11 = vmax.f32 %v946_v10, 0.0 }
 0x3a6   :  { %v591_v12 = vpop.f32.mrf.mxu0 }
 0x3a7   :  { %v681_v13 = vmax.f32 %v591_v12, 0.0  ;;  %v706_v14 = vmul.f32 %v704_v58, %v682_v11  ;;  %v751_v54 = vsub.f32 %v1171_v30, %v682_v11 }
 0x3a8   :  { %v953_v15 = vpop.f32.mrf.mxu1 }
 0x3a9   :  { %v1232_v16 = vmax.f32 %v953_v15, 0.0  ;;  %711 = vadd.xlane.f32.xlu1 %v706_v14  ;;  %v705_v17 = vmul.f32 %v704_v58, %v681_v13  ;;  %v750_v59 = vsub.f32 %v1168_v4, %v681_v13 }
 0x3aa   :  { %v672_v18 = vpop.f32.mrf.mxu1 }
 0x3ab   :  { %v683_v19 = vmax.f32 %v672_v18, 0.0  ;;  %709 = vadd.xlane.f32.xlu0 %v705_v17  ;;  %v708_v53 = vmul.f32 %v704_v58, %v1232_v16  ;;  %v753_v63 = vsub.f32 %v1177_v32, %v1232_v16 }
 0x3ad   :  { %715 = vadd.xlane.f32.xlu1 %v708_v53  ;;  %v707_v20 = vmul.f32 %v704_v58, %v683_v19  ;;  %v752_v3 = vsub.f32 %v1173_v31, %v683_v19 }
 0x3af   :  { %713 = vadd.xlane.f32.xlu0 %v707_v20 }
 0x432   :  { %v712_v24 = vpop.xlane.xlu1 %711 }
 0x433   :  { %v718_v25 = vadd.f32 %v712_v24, %v696_v22 }
 0x434   :  { %v710_v26 = vpop.xlane.xlu0 %709 }
 0x435   :  { %v723_v27 = vadd.f32 %v721_v23, %v718_v25  ;;  %v717_v28 = vadd.f32 %v710_v26, %v694_v51 }
 0x436   :  { %v716_v29 = vpop.xlane.xlu1 %715 }
 0x437   :  { %v791_v33 = vmul.f32 -1.442695, %v723_v27  ;;  %v722_v34 = vadd.f32 %v721_v23, %v717_v28  ;;  %v720_v35 = vadd.f32 %v716_v29, %v700_v21 }
 0x438   :  { %v714_v36 = vpop.xlane.xlu0 %713 }
 0x439   :  { %973 = vpow2.f32 %v791_v33  ;;  %v790_v37 = vmul.f32 -1.442695, %v722_v34  ;;  %v725_v38 = vadd.f32 %v721_v23, %v720_v35  ;;  %v719_v39 = vadd.f32 %v714_v36, %v698_v50 }
 0x43b   :  { %975 = vpow2.f32 %v790_v37  ;;  %v793_v40 = vmul.f32 -1.442695, %v725_v38  ;;  %v724_v41 = vadd.f32 %v721_v23, %v719_v39 }
 0x43d   :  { %977 = vpow2.f32 %v793_v40  ;;  %v792_v42 = vmul.f32 -1.442695, %v724_v41 }
 0x43f   :  { %979 = vpow2.f32 %v792_v42 }
 0x446   :  { %v974_v43 = vpop.eup %973 }
 0x447   :  { %v739_v44 = vadd.f32 1.0, %v974_v43 }
 0x448   :  { %v976_v45 = vpop.eup %975 }
 0x449   :  { %981 = vrcp.f32 %v739_v44  ;;  %v738_v46 = vadd.f32 1.0, %v976_v45 }
 0x44a   :  { %v978_v47 = vpop.eup %977 }
 0x44b   :  { %983 = vrcp.f32 %v738_v46  ;;  %v741_v48 = vadd.f32 1.0, %v978_v47 }
 0x44c   :  { %v980_v49 = vpop.eup %979 }
 0x44d   :  { %985 = vrcp.f32 %v741_v48  ;;  %v740_v52 = vadd.f32 1.0, %v980_v49 }
 0x44f   :  { %987 = vrcp.f32 %v740_v52 }
 0x456   :  { %v982_v55 = vpop.eup %981 }
 0x457   :  { %v755_v60 = vmul.f32 %v982_v55, %v751_v54 }
 0x458   :  { %v984_v62 = vpop.eup %983 }
 0x459   :  { %v754_v0 = vmul.f32 %v984_v62, %v750_v59  ;;  %v759_v1 = vadd.f32 %v755_v60, %v682_v11 }
 0x45a   :  { %v986_v2 = vpop.eup %985 }
 0x45b   :  { %v757_v5 = vmul.f32 %v986_v2, %v753_v63  ;;  %v758_v6 = vadd.f32 %v754_v0, %v681_v13  ;;  %763 = vst [vmem:[#allocation11 + $0x8] sm:$0xff] %v759_v1 }
 0x45c   :  { %v988_v7 = vpop.eup %987 }
 0x45d   :  { %v756_v30 = vmul.f32 %v988_v7, %v752_v3  ;;  %v761_v8 = vadd.f32 %v757_v5, %v1232_v16  ;;  %762 = vst [vmem:[#allocation11] sm:$0xff] %v758_v6 }
 0x45f   :  { %v760_v4 = vadd.f32 %v756_v30, %v683_v19  ;;  %765 = vst [vmem:[#allocation11 + $0x18] sm:$0xff] %v761_v8 }
 0x461   :  { %764 = vst [vmem:[#allocation11 + $0x10] sm:$0xff] %v760_v4 }
 0x462   :  { %1080 = shalt.err (!%p1077_p10)
}
 0x463   :  { %777 = dma.vmem_to_hbm [thread:$0]  %s772_s23, 512, %s1257_s7, [#allocation5], %s1099_s29, %s1099_s29, %s1100_s30  }
 0x464   :  { %1095 = dma.done.wait [#allocation5], 512  }
 0x465   :  { %1096 = vsyncadd [#allocation5], 4294966784 }
 0x466   :  { %781 = vsyncpa [#allocation4], 1 }
 0x467   :  { %782 = vsyncpa [#allocation7], 1 }
 0x468   :  { %783 = vsyncpa [#allocation10], 1 }
 0x469   :  { %784 = vsyncpa [#allocation5], 1 }

</bundles_post_ra>
